<compile_context>
chip_gen: v6e
topology: v6e:2x2x1
jax: 0.10.0
libtpu: 0.0.40
codegen_flags: <defaults>
</compile_context>

<pallas_src>
import functools
import math

import jax
import jax.numpy as jnp
from jax.experimental import pallas as pl
from jax.experimental.pallas import tpu as pltpu

MAX_LENGTH = 30


def _round128(n):
  return ((n + 127) // 128) * 128


def _attn_decoder_kernel(idx_ref, emb_hbm, h_ref, encp_ref, weh_ref, wx_ref,
                         b_ref, out_ref, e_buf, dma_sem, *,
                         H, L, O, W_EH, W_IH, W_OUT, OSEG, HSEG, LSEG):
  f32 = jnp.float32
  tok = idx_ref[0]

  # Gather only the needed embedding row from HBM (dropout = identity in eval).
  row_cp = pltpu.make_async_copy(emb_hbm.at[pl.ds(tok, 1)], e_buf, dma_sem)
  row_cp.start()

  out_ref[...] = jnp.zeros_like(out_ref)      # deterministic padding lanes
  h = h_ref[...]                              # (1, H) previous hidden

  row_cp.wait()
  e = e_buf[...]                              # (1, H) embedded token

  # Single fused projection of [embedded | hidden]:
  #   cols [0:H)     = attn_combine weights applied to embedded (+ comb bias)
  #   cols [H:4H)    = GRU hh gates r,z,n (+ hh bias)
  #   cols [4H:4H+L) = attention logits, e- and h-parts pre-summed (+ attn bias)
  eh = jnp.concatenate([e, h], axis=1)        # (1, 2H)
  p_eh = (jnp.dot(eh, weh_ref[...], preferred_element_type=f32)
          + b_ref[:, 0:W_EH])

  # attn_weights = softmax(attn(cat(embedded, hidden)))
  s = p_eh[:, 4 * H:4 * H + L]
  s = s - jnp.max(s, axis=-1, keepdims=True)
  ps = jnp.exp(s)
  aw = ps * pl.reciprocal(jnp.sum(ps, axis=-1, keepdims=True), approx=False)

  # relu(attn_combine(cat(embedded, attn_applied)))
  #   attn_applied @ W_ctx^T  ==  aw @ (enc @ W_ctx^T)  ==  aw @ enc_proj
  pc = jnp.dot(aw, encp_ref[...], preferred_element_type=f32)     # (1, H)
  x = jnp.maximum(p_eh[:, 0:H] + pc, 0.0)

  # Single GRU step, PyTorch gate order (r, z, n).
  px = (jnp.dot(x, wx_ref[:, 0:W_IH], preferred_element_type=f32)
        + b_ref[:, W_EH:W_EH + W_IH])
  r = jax.nn.sigmoid(px[:, 0:H] + p_eh[:, H:2 * H])
  z = jax.nn.sigmoid(px[:, H:2 * H] + p_eh[:, 2 * H:3 * H])
  n = jnp.tanh(px[:, 2 * H:3 * H] + r * p_eh[:, 3 * H:4 * H])
  hn = (1.0 - z) * n + z * h                                      # (1, H)

  # output = log_softmax(out(gru_output))
  po = (jnp.dot(hn, wx_ref[:, W_IH:W_IH + W_OUT], preferred_element_type=f32)
        + b_ref[:, W_EH + W_IH:W_EH + W_IH + W_OUT])
  o = po[:, 0:O]
  o = o - jnp.max(o, axis=-1, keepdims=True)
  lse = jnp.log(jnp.sum(jnp.exp(o), axis=-1, keepdims=True))

  # Lane-dense packed output: [logp|pad][hn|pad][aw|pad] in 128-lane segments.
  out_ref[:, 0:O] = o - lse
  out_ref[:, OSEG:OSEG + H] = hn
  out_ref[:, OSEG + HSEG:OSEG + HSEG + L] = aw


def init_params(key, hidden_size, output_size, max_length):
  """Deterministic parameters with PyTorch-compatible shapes/layouts."""
  H, O, L = hidden_size, output_size, max_length
  ks = jax.random.split(key, 12)

  def uni(k, shape, fan_in):
    b = 1.0 / math.sqrt(fan_in)
    return jax.random.uniform(k, shape, jnp.float32, -b, b)

  return {
      "embedding": jax.random.normal(ks[0], (O, H), jnp.float32),
      "attn_w": uni(ks[1], (L, 2 * H), 2 * H),
      "attn_b": uni(ks[2], (L,), 2 * H),
      "comb_w": uni(ks[3], (H, 2 * H), 2 * H),
      "comb_b": uni(ks[4], (H,), 2 * H),
      "gru_w_ih": uni(ks[5], (3 * H, H), H),
      "gru_w_hh": uni(ks[6], (3 * H, H), H),
      "gru_b_ih": uni(ks[7], (3 * H,), H),
      "gru_b_hh": uni(ks[8], (3 * H,), H),
      "out_w": uni(ks[9], (O, H), H),
      "out_b": uni(ks[10], (O,), H),
  }


def prepare_params(params, hidden_size, output_size, max_length):
  """One-time packing of PyTorch-layout params into kernel-facing slabs."""
  H, O, L = hidden_size, output_size, max_length
  f32 = jnp.float32
  W_EH = _round128(4 * H + L)
  W_IH = _round128(3 * H)
  W_OUT = _round128(O)

  attn_w = params["attn_w"].astype(f32)
  attn_b = params["attn_b"].astype(f32)
  comb_w = params["comb_w"].astype(f32)
  comb_b = params["comb_b"].astype(f32)
  w_ih = params["gru_w_ih"].astype(f32)
  w_hh = params["gru_w_hh"].astype(f32)
  b_ih = params["gru_b_ih"].astype(f32)
  b_hh = params["gru_b_hh"].astype(f32)
  out_w = params["out_w"].astype(f32)
  out_b = params["out_b"].astype(f32)

  # Fused [embedded | hidden] segment (rows 0:H = e rows, rows H:2H = h rows).
  w_eh = jnp.zeros((2 * H, W_EH), f32)
  w_eh = w_eh.at[0:H, 0:H].set(comb_w[:, :H].T)            # combine_e
  w_eh = w_eh.at[H:2 * H, H:4 * H].set(w_hh.T)             # GRU hh (r,z,n)
  w_eh = w_eh.at[0:H, 4 * H:4 * H + L].set(attn_w[:, :H].T)    # attn (e part)
  w_eh = w_eh.at[H:2 * H, 4 * H:4 * H + L].set(attn_w[:, H:].T)  # attn (h part)

  # Segments whose LHS is H-wide (relu output -> GRU ih; new hidden -> out).
  w_x = jnp.zeros((H, W_IH + W_OUT), f32)
  w_x = w_x.at[:, 0:3 * H].set(w_ih.T)
  w_x = w_x.at[:, W_IH:W_IH + O].set(out_w.T)

  b_all = jnp.zeros((1, W_EH + W_IH + W_OUT), f32)
  b_all = b_all.at[0, 0:H].set(comb_b)
  b_all = b_all.at[0, H:4 * H].set(b_hh)
  b_all = b_all.at[0, 4 * H:4 * H + L].set(attn_b)
  b_all = b_all.at[0, W_EH:W_EH + 3 * H].set(b_ih)
  b_all = b_all.at[0, W_EH + W_IH:W_EH + W_IH + O].set(out_b)

  return {
      "embedding": params["embedding"].astype(f32),
      "w_eh": w_eh,
      "w_x": w_x,
      "b_all": b_all,
      # attn_combine's context half, folded into the encoder outputs per-sequence.
      "ctx_proj_w": comb_w[:, H:].T,   # (H, H)
  }


def attention_decoder_forward(packed, input_idx, hidden, encoder_outputs):
  """input_idx: scalar int token id; hidden: (1,1,H); encoder_outputs: (L,H)."""
  f32 = jnp.float32
  H = hidden.shape[-1]
  L = encoder_outputs.shape[0]
  O = packed["embedding"].shape[0]
  W_EH = packed["w_eh"].shape[1]
  W_OUT = _round128(O)
  W_IH = packed["w_x"].shape[1] - W_OUT
  OSEG, HSEG, LSEG = _round128(O), _round128(H), _round128(L)
  tot = OSEG + HSEG + LSEG

  idx = jnp.asarray(input_idx, dtype=jnp.int32).reshape(1)
  h0 = hidden.reshape(1, H).astype(f32)
  # Fixed per sequence: fold attn_combine's ctx half into the encoder outputs
  # once (hoist this outside the decode loop when running multiple steps).
  enc_proj = jnp.dot(encoder_outputs.astype(f32), packed["ctx_proj_w"],
                     preferred_element_type=f32)                  # (L, H)

  kernel = functools.partial(
      _attn_decoder_kernel, H=H, L=L, O=O, W_EH=W_EH, W_IH=W_IH, W_OUT=W_OUT,
      OSEG=OSEG, HSEG=HSEG, LSEG=LSEG)

  vmem = pltpu.MemorySpace.VMEM
  smem = pltpu.MemorySpace.SMEM

  cost = pl.CostEstimate(
      flops=2 * (2 * H) * W_EH + 2 * L * H + 2 * H * W_IH + 2 * H * W_OUT,
      transcendentals=L + O + 3 * H + 4,
      bytes_accessed=4 * (2 * H * W_EH + H * (W_IH + W_OUT)
                          + (W_EH + W_IH + W_OUT) + L * H + 3 * H + tot + 1),
  )

  out = pl.pallas_call(
      kernel,
      out_shape=jax.ShapeDtypeStruct((1, tot), f32),
      in_specs=[
          pl.BlockSpec(memory_space=smem),    # token id (1,)
          pl.BlockSpec(memory_space=pl.ANY),  # embedding table stays in HBM
          pl.BlockSpec(memory_space=vmem),    # hidden (1, H)
          pl.BlockSpec(memory_space=vmem),    # enc_proj (L, H)
          pl.BlockSpec(memory_space=vmem),    # fused (e,h) weight slab (2H, W_EH)
          pl.BlockSpec(memory_space=vmem),    # ih+out weight slab (H, W_IH+W_OUT)
          pl.BlockSpec(memory_space=vmem),    # bias slab (1, W_EH+W_IH+W_OUT)
      ],
      out_specs=pl.BlockSpec(memory_space=vmem),
      scratch_shapes=[
          pltpu.VMEM((1, H), f32),            # gathered embedding row
          pltpu.SemaphoreType.DMA(()),        # its DMA completion semaphore
      ],
      compiler_params=pltpu.CompilerParams(vmem_limit_bytes=4 * 1024 * 1024),
      cost_estimate=cost,
  )(idx, packed["embedding"], h0, enc_proj, packed["w_eh"], packed["w_x"],
    packed["b_all"])

  logp = out[:, 0:O]
  hnew = out[:, OSEG:OSEG + H]
  attnw = out[:, OSEG + HSEG:OSEG + HSEG + L]
  return logp, hnew.reshape(1, 1, H), attnw


def _reference_forward(params, input_idx, hidden, encoder_outputs):
  """Pure-JAX reference mirroring the PyTorch forward (eval-mode dropout)."""
  H = hidden.shape[-1]
  emb = params["embedding"][input_idx].reshape(1, H)
  h = hidden.reshape(1, H)
  cat1 = jnp.concatenate([emb, h], axis=1)
  aw = jax.nn.softmax(cat1 @ params["attn_w"].T + params["attn_b"], axis=1)
  ctx = aw @ encoder_outputs
  cat2 = jnp.concatenate([emb, ctx], axis=1)
  x = jax.nn.relu(cat2 @ params["comb_w"].T + params["comb_b"])
  gi = x @ params["gru_w_ih"].T + params["gru_b_ih"]
  gh = h @ params["gru_w_hh"].T + params["gru_b_hh"]
  r = jax.nn.sigmoid(gi[:, :H] + gh[:, :H])
  z = jax.nn.sigmoid(gi[:, H:2 * H] + gh[:, H:2 * H])
  n = jnp.tanh(gi[:, 2 * H:] + r * gh[:, 2 * H:])
  hn = (1.0 - z) * n + z * h
  logp = jax.nn.log_softmax(hn @ params["out_w"].T + params["out_b"], axis=1)
  return logp, hn.reshape(1, 1, H), aw


if __name__ == "__main__":
  hidden_size = 32
  output_size = 16
  max_length = MAX_LENGTH

  key = jax.random.PRNGKey(0)
  k_par, k_hid, k_enc, k_tok = jax.random.split(key, 4)

  params = init_params(k_par, hidden_size, output_size, max_length)
  packed = prepare_params(params, hidden_size, output_size, max_length)

  input_idx = jax.random.randint(k_tok, (), 0, output_size, dtype=jnp.int32)
  hidden = jax.random.normal(k_hid, (1, 1, hidden_size), jnp.float32)
  encoder_outputs = jax.random.normal(k_enc, (max_length, hidden_size),
                                      jnp.float32)

  fwd = jax.jit(attention_decoder_forward)
  logp, hnew, attnw = fwd(packed, input_idx, hidden, encoder_outputs)
  jax.block_until_ready((logp, hnew, attnw))

  r_logp, r_hnew, r_attnw = _reference_forward(
      params, input_idx, hidden, encoder_outputs)
  assert jnp.allclose(logp, r_logp, atol=1e-5, rtol=1e-5)
  assert jnp.allclose(hnew, r_hnew, atol=1e-5, rtol=1e-5)
  assert jnp.allclose(attnw, r_attnw, atol=1e-5, rtol=1e-5)

  print("KERNEL_OK")
</pallas_src>

<mosaic_0001>
module attributes {stable_mosaic.version = 11 : i64} {
  func.func @_attn_decoder_kernel(%arg0: memref<1xi32, #tpu.memory_space<smem>>, %arg1: memref<16x32xf32, #tpu.memory_space<any>>, %arg2: memref<1x32xf32, #tpu.memory_space<vmem>>, %arg3: memref<30x32xf32, #tpu.memory_space<vmem>>, %arg4: memref<64x256xf32, #tpu.memory_space<vmem>>, %arg5: memref<32x256xf32, #tpu.memory_space<vmem>>, %arg6: memref<1x512xf32, #tpu.memory_space<vmem>>, %arg7: memref<1x384xf32, #tpu.memory_space<vmem>>, %arg8: memref<1x32xf32, #tpu.memory_space<vmem>>, %arg9: memref<!tpu.dma_semaphore, #tpu.memory_space<semaphore_mem>>) attributes {dimension_semantics = [], scalar_prefetch = 0 : i64, scratch_operands = 2 : i64, tpu.core_type = #tpu.core_type<tc>} {
    %c0 = arith.constant 0 : index
    %0 = memref.load %arg0[%c0] : memref<1xi32, #tpu.memory_space<smem>>
    %c0_i32 = arith.constant 0 : i32
    %1 = tpu.memref_slice %arg1[%0, %c0_i32] : memref<16x32xf32, #tpu.memory_space<any>> -> memref<1x32xf32, #tpu.memory_space<any>>
    tpu.enqueue_dma source(%1 : memref<1x32xf32, #tpu.memory_space<any>>) target(%arg8 : memref<1x32xf32, #tpu.memory_space<vmem>>) target_semaphore(%arg9 : memref<!tpu.dma_semaphore, #tpu.memory_space<semaphore_mem>>)
    %cst = arith.constant 0.000000e+00 : f32
    %2 = vector.broadcast %cst : f32 to vector<1x384xf32>
    %c0_0 = arith.constant 0 : index
    %c0_1 = arith.constant 0 : index
    %3 = vector.load %arg7[%c0_0, %c0_1] : memref<1x384xf32, #tpu.memory_space<vmem>>, vector<1x384xf32>
    tpu.vector_store %arg7[%c0_0, %c0_1], %2 {strides = array<i32>} : memref<1x384xf32, #tpu.memory_space<vmem>>, vector<1x384xf32>,
    %c0_2 = arith.constant 0 : index
    %c0_3 = arith.constant 0 : index
    %4 = vector.load %arg2[%c0_2, %c0_3] : memref<1x32xf32, #tpu.memory_space<vmem>>, vector<1x32xf32>
    %c0_i32_4 = arith.constant 0 : i32
    %5 = tpu.memref_slice %arg1[%0, %c0_i32_4] : memref<16x32xf32, #tpu.memory_space<any>> -> memref<1x32xf32, #tpu.memory_space<any>>
    tpu.wait_dma2 semaphore(%arg9 : memref<!tpu.dma_semaphore, #tpu.memory_space<semaphore_mem>>) src(%5 : memref<1x32xf32, #tpu.memory_space<any>>) dst(%arg8 : memref<1x32xf32, #tpu.memory_space<vmem>>)
    %c0_5 = arith.constant 0 : index
    %c0_6 = arith.constant 0 : index
    %6 = vector.load %arg8[%c0_5, %c0_6] : memref<1x32xf32, #tpu.memory_space<vmem>>, vector<1x32xf32>
    %7 = tpu.concatenate %6, %4 in 1 : vector<1x32xf32>, vector<1x32xf32> -> vector<1x64xf32>
    %c0_7 = arith.constant 0 : index
    %c0_8 = arith.constant 0 : index
    %8 = vector.load %arg4[%c0_7, %c0_8] : memref<64x256xf32, #tpu.memory_space<vmem>>, vector<64x256xf32>
    %cst_9 = arith.constant dense<0.000000e+00> : vector<1x256xf32>
    %9 = tpu.matmul %7, %8, %cst_9 {dimension_numbers = #tpu.dot_dimension_numbers<[1], [0], [0], [1], [0, 0, 1, 1], [], []>} : vector<1x64xf32>, vector<64x256xf32>, vector<1x256xf32> -> vector<1x256xf32>
    %c0_10 = arith.constant 0 : index
    %c0_11 = arith.constant 0 : index
    %10 = vector.load %arg6[%c0_10, %c0_11] : memref<1x512xf32, #tpu.memory_space<vmem>>, vector<1x256xf32>
    %11 = arith.addf %9, %10 : vector<1x256xf32>
    %12 = vector.extract_strided_slice %11 {offsets = [0, 128], sizes = [1, 30], strides = [1, 1]} : vector<1x256xf32> to vector<1x30xf32>
    %cst_12 = arith.constant dense<0xFF800000> : vector<1xf32>
    %13 = vector.multi_reduction <maximumf>, %12, %cst_12 [1] : vector<1x30xf32> to vector<1xf32>
    %14 = vector.shape_cast %13 : vector<1xf32> to vector<1x1xf32>
    %15 = vector.broadcast %14 : vector<1x1xf32> to vector<1x30xf32>
    %16 = arith.subf %12, %15 : vector<1x30xf32>
    %17 = math.exp %16 : vector<1x30xf32>
    %cst_13 = arith.constant dense<0.000000e+00> : vector<1xf32>
    %18 = vector.multi_reduction <add>, %17, %cst_13 [1] : vector<1x30xf32> to vector<1xf32>
    %19 = vector.shape_cast %18 : vector<1xf32> to vector<1x1xf32>
    %20 = tpu.reciprocal %19 : vector<1x1xf32> -> vector<1x1xf32>
    %21 = vector.broadcast %20 : vector<1x1xf32> to vector<1x30xf32>
    %22 = arith.mulf %17, %21 : vector<1x30xf32>
    %c0_14 = arith.constant 0 : index
    %c0_15 = arith.constant 0 : index
    %23 = vector.load %arg3[%c0_14, %c0_15] : memref<30x32xf32, #tpu.memory_space<vmem>>, vector<30x32xf32>
    %cst_16 = arith.constant dense<0.000000e+00> : vector<1x32xf32>
    %24 = tpu.matmul %22, %23, %cst_16 {dimension_numbers = #tpu.dot_dimension_numbers<[1], [0], [0], [1], [0, 0, 1, 1], [], []>} : vector<1x30xf32>, vector<30x32xf32>, vector<1x32xf32> -> vector<1x32xf32>
    %25 = vector.extract_strided_slice %11 {offsets = [0, 0], sizes = [1, 32], strides = [1, 1]} : vector<1x256xf32> to vector<1x32xf32>
    %26 = arith.addf %25, %24 : vector<1x32xf32>
    %cst_17 = arith.constant 0.000000e+00 : f32
    %27 = vector.broadcast %cst_17 : f32 to vector<1x32xf32>
    %28 = arith.maximumf %26, %27 : vector<1x32xf32>
    %c0_18 = arith.constant 0 : index
    %c0_19 = arith.constant 0 : index
    %29 = vector.load %arg5[%c0_18, %c0_19] : memref<32x256xf32, #tpu.memory_space<vmem>>, vector<32x128xf32>
    %cst_20 = arith.constant dense<0.000000e+00> : vector<1x128xf32>
    %30 = tpu.matmul %28, %29, %cst_20 {dimension_numbers = #tpu.dot_dimension_numbers<[1], [0], [0], [1], [0, 0, 1, 1], [], []>} : vector<1x32xf32>, vector<32x128xf32>, vector<1x128xf32> -> vector<1x128xf32>
    %c0_21 = arith.constant 0 : index
    %c256 = arith.constant 256 : index
    %31 = vector.load %arg6[%c0_21, %c256] : memref<1x512xf32, #tpu.memory_space<vmem>>, vector<1x128xf32>
    %32 = arith.addf %30, %31 : vector<1x128xf32>
    %33 = vector.extract_strided_slice %32 {offsets = [0, 0], sizes = [1, 32], strides = [1, 1]} : vector<1x128xf32> to vector<1x32xf32>
    %34 = vector.extract_strided_slice %11 {offsets = [0, 32], sizes = [1, 32], strides = [1, 1]} : vector<1x256xf32> to vector<1x32xf32>
    %35 = arith.addf %33, %34 : vector<1x32xf32>
    %36 = arith.negf %35 : vector<1x32xf32>
    %37 = math.exp %36 : vector<1x32xf32>
    %cst_22 = arith.constant 1.000000e+00 : f32
    %38 = vector.broadcast %cst_22 : f32 to vector<1x32xf32>
    %39 = arith.addf %38, %37 : vector<1x32xf32>
    %40 = arith.divf %38, %39 : vector<1x32xf32>
    %41 = vector.extract_strided_slice %32 {offsets = [0, 32], sizes = [1, 32], strides = [1, 1]} : vector<1x128xf32> to vector<1x32xf32>
    %42 = vector.extract_strided_slice %11 {offsets = [0, 64], sizes = [1, 32], strides = [1, 1]} : vector<1x256xf32> to vector<1x32xf32>
    %43 = arith.addf %41, %42 : vector<1x32xf32>
    %44 = arith.negf %43 : vector<1x32xf32>
    %45 = math.exp %44 : vector<1x32xf32>
    %cst_23 = arith.constant 1.000000e+00 : f32
    %46 = vector.broadcast %cst_23 : f32 to vector<1x32xf32>
    %47 = arith.addf %46, %45 : vector<1x32xf32>
    %48 = arith.divf %46, %47 : vector<1x32xf32>
    %49 = vector.extract_strided_slice %32 {offsets = [0, 64], sizes = [1, 32], strides = [1, 1]} : vector<1x128xf32> to vector<1x32xf32>
    %50 = vector.extract_strided_slice %11 {offsets = [0, 96], sizes = [1, 32], strides = [1, 1]} : vector<1x256xf32> to vector<1x32xf32>
    %51 = arith.mulf %40, %50 : vector<1x32xf32>
    %52 = arith.addf %49, %51 : vector<1x32xf32>
    %53 = math.tanh %52 : vector<1x32xf32>
    %cst_24 = arith.constant 1.000000e+00 : f32
    %54 = vector.broadcast %cst_24 : f32 to vector<1x32xf32>
    %55 = arith.subf %54, %48 : vector<1x32xf32>
    %56 = arith.mulf %55, %53 : vector<1x32xf32>
    %57 = arith.mulf %48, %4 : vector<1x32xf32>
    %58 = arith.addf %56, %57 : vector<1x32xf32>
    %c0_25 = arith.constant 0 : index
    %c128 = arith.constant 128 : index
    %59 = vector.load %arg5[%c0_25, %c128] : memref<32x256xf32, #tpu.memory_space<vmem>>, vector<32x128xf32>
    %cst_26 = arith.constant dense<0.000000e+00> : vector<1x128xf32>
    %60 = tpu.matmul %58, %59, %cst_26 {dimension_numbers = #tpu.dot_dimension_numbers<[1], [0], [0], [1], [0, 0, 1, 1], [], []>} : vector<1x32xf32>, vector<32x128xf32>, vector<1x128xf32> -> vector<1x128xf32>
    %c0_27 = arith.constant 0 : index
    %c384 = arith.constant 384 : index
    %61 = vector.load %arg6[%c0_27, %c384] : memref<1x512xf32, #tpu.memory_space<vmem>>, vector<1x128xf32>
    %62 = arith.addf %60, %61 : vector<1x128xf32>
    %63 = vector.extract_strided_slice %62 {offsets = [0, 0], sizes = [1, 16], strides = [1, 1]} : vector<1x128xf32> to vector<1x16xf32>
    %cst_28 = arith.constant dense<0xFF800000> : vector<1xf32>
    %64 = vector.multi_reduction <maximumf>, %63, %cst_28 [1] : vector<1x16xf32> to vector<1xf32>
    %65 = vector.shape_cast %64 : vector<1xf32> to vector<1x1xf32>
    %66 = vector.broadcast %65 : vector<1x1xf32> to vector<1x16xf32>
    %67 = arith.subf %63, %66 : vector<1x16xf32>
    %68 = math.exp %67 : vector<1x16xf32>
    %cst_29 = arith.constant dense<0.000000e+00> : vector<1xf32>
    %69 = vector.multi_reduction <add>, %68, %cst_29 [1] : vector<1x16xf32> to vector<1xf32>
    %70 = vector.shape_cast %69 : vector<1xf32> to vector<1x1xf32>
    %71 = math.log %70 : vector<1x1xf32>
    %72 = vector.broadcast %71 : vector<1x1xf32> to vector<1x16xf32>
    %73 = arith.subf %67, %72 : vector<1x16xf32>
    %c0_30 = arith.constant 0 : index
    %c0_31 = arith.constant 0 : index
    %74 = vector.load %arg7[%c0_30, %c0_31] : memref<1x384xf32, #tpu.memory_space<vmem>>, vector<1x16xf32>
    tpu.vector_store %arg7[%c0_30, %c0_31], %73 {strides = array<i32>} : memref<1x384xf32, #tpu.memory_space<vmem>>, vector<1x16xf32>,
    %c0_32 = arith.constant 0 : index
    %c128_33 = arith.constant 128 : index
    %75 = vector.load %arg7[%c0_32, %c128_33] : memref<1x384xf32, #tpu.memory_space<vmem>>, vector<1x32xf32>
    tpu.vector_store %arg7[%c0_32, %c128_33], %58 {strides = array<i32>} : memref<1x384xf32, #tpu.memory_space<vmem>>, vector<1x32xf32>,
    %c0_34 = arith.constant 0 : index
    %c256_35 = arith.constant 256 : index
    %76 = vector.load %arg7[%c0_34, %c256_35] : memref<1x384xf32, #tpu.memory_space<vmem>>, vector<1x30xf32>
    tpu.vector_store %arg7[%c0_34, %c256_35], %22 {strides = array<i32>} : memref<1x384xf32, #tpu.memory_space<vmem>>, vector<1x30xf32>,
    return
  }
}

</mosaic_0001>

<bundles_post_ra>
// kernel: attention_decoder_forward.1
= control target key start
LH: loop header
LB: loop body
LE: loop exit
PB: predicated region body
PF: predicated region fallthrough
CT: control target
= control target key end

     0   :  { %13 = vsyncpa [#allocation6], 0  ;;  %s657_s24 = smov [#allocation5]   ;;  %s820_s0 = inlined_call_operand.<no memory space> [shape: s32[1], index: 0, kind: input, shape index: {}]   ;;  %s821_s1 = inlined_call_operand.vmem [shape: f32[16,32], index: 1, kind: input, shape index: {}]   ;;  %s822_s2 = inlined_call_operand.vmem [shape: f32[1,32], index: 2, kind: input, shape index: {}]   ;;  %s823_s3 = inlined_call_operand.vmem [shape: f32[30,32], index: 3, kind: input, shape index: {}]   ;;  %s824_s4 = inlined_call_operand.hbm [shape: f32[64,256], index: 4, kind: input, shape index: {}]   ;;  %s825_s5 = inlined_call_operand.vmem [shape: f32[32,256], index: 5, kind: input, shape index: {}]   ;;  %s826_s6 = inlined_call_operand.vmem [shape: f32[1,512], index: 6, kind: input, shape index: {}]   ;;  %s827_s7 = inlined_call_operand.vmem [shape: f32[1,384], index: 7, kind: output, shape index: {}]  }
   0x1   :  { %s25_s25 = sshll.u32 %s657_s24, 4  ;;  %s26_s25 = int_to_ptr.vmem [resolvable:$true] %s25_s25 }
   0x2   :  { %s641_s26 = scalar_lea.vmem %s26_s25, 2048  ;;  %p646_p1 = scmp.lt.s32.totalorder %s26_s25, %s26_s25 }
   0x3   :  { %p642_p0 = scmp.ne.s32.totalorder %s26_s25, %s641_s26  ;;  %p647_p2 = scmp.lt.s32.totalorder %s641_s26, %s641_s26 }
   0x5   :  { %p648_p3 = por %p647_p2, %p646_p1 }
   0x7   :  { %p649_p4 = pnand %p648_p3, %p642_p0 }
   0x9   :  { %652 = shalt.err (!%p649_p4)
}
   0xa   :  { %s658_s27 = smov 256   ;;  %s659_s28 = smov 16  }
   0xb   :  { %31 = dma.hbm_to_vmem [thread:$0]  %s824_s4, 2048, %s26_s25, [#allocation6], %s658_s27, %s658_s27, %s659_s28  }
   0xc   :  { %653 = dma.done.wait [#allocation6], 2048  }
   0xd   :  { %654 = vsyncadd [#allocation6], 4294965248  ;;  %s40_s12 = scalar_lea.vmem %s821_s1, %s820_s0 }
   0xe   :  { %v59_v0 = vld [vmem:[%s40_s12] sm:$0x1] }
   0xf   :  { %60 = vst [vmem:[#allocation2] sm:$0x1] %v59_v0 }
  0x10   :  { %86 = vsyncadd [#allocation3], 16  ;;  %v87_v1 = vlaneseq  ;;  %v554_v2 = vld [vmem:[%s822_s2] ss:$0 sm:$0xff]  ;;  %v660_v3 = vmov 0.0  }
  0x12   :  { %vm89_vm0 = vcmp.lt.s32.totalorder %v87_v1, 384 }
  0x13   :  { %91 = vst.msk [vmem:[%s827_s7] sm:$0x7] %vm89_vm0, %v660_v3 }
  0x14   :  { %655 = dma.done.wait [#allocation3], 16 }
  0x15   :  { %656 = vsyncadd [#allocation3], 4294967280  ;;  %203 = vmatprep.mubr.f32.mxu0 %v660_v3  ;;  %577 = vmatprep.subr.mxu1 %v660_v3  ;;  %s661_s0 = smov 32   ;;  %v122_v4 = vld [vmem:[#allocation5 + $0x78] sm:$0xff]  ;;  %v121_v5 = vld [vmem:[#allocation5 + $0x70] sm:$0xff]  ;;  %vm105_vm1 = vcmask 261120  }
  0x16   :  { %102 = vrot.lane.b32.xlu0 %v554_v2, %s661_s0  ;;  %v120_v6 = vld [vmem:[#allocation5 + $0x68] sm:$0xff]  ;;  %155 = vmatprep.subr.mxu0 %v122_v4  ;;  %v119_v7 = vld [vmem:[#allocation5 + $0x60] sm:$0xff]  ;;  %v118_v8 = vld [vmem:[#allocation5 + $0x58] sm:$0xff]  ;;  %vm135_vm2 = vcmask 523264   ;;  %v732_v23 = vshrl.u32 %v87_v1, 7  ;;  %vm210_vm3 = vcmask 237568  }
  0x17   :  { %156 = vmatpush1.msra.mxu0 %v121_v5  ;;  %v117_v9 = vld [vmem:[#allocation5 + $0x50] sm:$0xff]  ;;  %v116_v10 = vld [vmem:[#allocation5 + $0x48] sm:$0xff]  ;;  %v115_v11 = vld [vmem:[#allocation5 + $0x40] sm:$0xff]  ;;  %s662_s16 = smov 96   ;;  %vm230_vm4 = vcmask 1045504   ;;  %vm663_vm5 = vmmov 0  }
  0x18   :  { %157 = vmatprep.subr.mxu0 %v120_v6  ;;  %v114_v12 = vld [vmem:[#allocation5 + $0x38] sm:$0xff]  ;;  %v113_v13 = vld [vmem:[#allocation5 + $0x30] sm:$0xff]  ;;  %v112_v14 = vld [vmem:[#allocation5 + $0x28] sm:$0xff]  ;;  %v131_v24 = vsub.s32 1, %v732_v23  ;;  %v127_v36 = vsub.s32 0, %v732_v23  ;;  %585 = vmatprep.mubr.msk.f32.mxu1 %vm663_vm5, %v660_v3  ;;  %vm226_vm6 = vcmask 244736  }
  0x19   :  { %158 = vmatpush1.msra.mxu0 %v119_v7  ;;  %v111_v15 = vld [vmem:[#allocation5 + $0x20] sm:$0xff]  ;;  %v110_v16 = vld [vmem:[#allocation5 + $0x18] sm:$0xff]  ;;  %v109_v17 = vld [vmem:[#allocation5 + $0x10] sm:$0xff]  ;;  %vm529_vm7 = vcmp.lt.s32.totalorder %v87_v1, 30  ;;  %s664_s13 = smov 64   ;;  %vm493_vm8 = vcmask 122880  }
  0x1a   :  { %159 = vmatprep.subr.mxu0 %v118_v8  ;;  %v108_v18 = vld [vmem:[#allocation5 + $0x8] sm:$0xff]  ;;  %v107_v19 = vld [vmem:[#allocation5] sm:$0xff]  ;;  %v96_v20 = vld [vmem:[#allocation2] sm:$0x1]  ;;  %vm526_vm9 = vcmp.lt.s32.totalorder %v87_v1, 32  ;;  %vm506_vm10 = vcmp.lt.s32.totalorder %v87_v1, 16 }
  0x1b   :  { %160 = vmatpush1.msra.mxu0 %v117_v9  ;;  %v123_v25 = vld [vmem:[%s826_s6] sm:$0x3]  ;;  %v225_v39 = vld [vmem:[%s823_s3 + $0x18] sm:$0x3f]  ;;  %v224_v40 = vld [vmem:[%s823_s3 + $0x10] sm:$0xff] }
  0x1c   :  { %161 = vmatprep.subr.mxu0 %v116_v10  ;;  %v132_v26 = vrot.slane %v123_v25, %v131_v24  ;;  %v128_v37 = vrot.slane %v123_v25, %v127_v36  ;;  %578 = vmatpush3.msk.msra.mxu1 %vm230_vm4, %v225_v39  ;;  %v223_v41 = vld [vmem:[%s823_s3 + $0x8] sm:$0xff]  ;;  %v222_v42 = vld [vmem:[%s823_s3] sm:$0xff]  ;;  %v309_v46 = vld [vmem:[%s825_s5 + $0x30] sm:$0xff] }
  0x1d   :  { %162 = vmatpush1.msra.mxu0 %v115_v11  ;;  %579 = vmatprep.subr.mxu1 %v660_v3  ;;  %v308_v47 = vld [vmem:[%s825_s5 + $0x20] sm:$0xff]  ;;  %v307_v48 = vld [vmem:[%s825_s5 + $0x10] sm:$0xff]  ;;  %v416_v6 = vld [vmem:[%s825_s5 + $0x38] sm:$0xff] }
  0x1e   :  { %163 = vmatprep.subr.mxu0 %v114_v12  ;;  %580 = vmatpush3.msra.mxu1 %v224_v40  ;;  %v306_v49 = vld [vmem:[%s825_s5] sm:$0xff]  ;;  %v415_v7 = vld [vmem:[%s825_s5 + $0x28] sm:$0xff]  ;;  %v414_v8 = vld [vmem:[%s825_s5 + $0x18] sm:$0xff] }
  0x1f   :  { %164 = vmatpush1.msra.mxu0 %v113_v13  ;;  %581 = vmatprep.subr.mxu1 %v660_v3  ;;  %v310_v54 = vld [vmem:[%s826_s6 + $0x2] sm:$0x1]  ;;  %v413_v9 = vld [vmem:[%s825_s5 + $0x8] sm:$0xff] }
  0x20   :  { %165 = vmatprep.subr.mxu0 %v112_v14  ;;  %582 = vmatpush3.msra.mxu1 %v223_v41 }
  0x21   :  { %166 = vmatpush1.msra.mxu0 %v111_v15  ;;  %583 = vmatprep.subr.mxu1 %v660_v3 }
  0x22   :  { %167 = vmatprep.subr.mxu0 %v110_v16  ;;  %584 = vmatpush3.msra.mxu1 %v222_v42 }
  0x23   :  { %168 = vmatpush1.msra.mxu0 %v109_v17  ;;  %588 = vmatprep.subr.mxu1 %v660_v3  ;;  %v417_v17 = vld [vmem:[%s826_s6 + $0x3] sm:$0x1] }
  0x24   :  { %169 = vmatprep.subr.mxu0 %v108_v18 }
  0x25   :  { %170 = vmatpush1.msra.mxu0 %v107_v19 }
  0x26   :  { %599 = vmatprep.subr.mxu0 %v660_v3 }
  0x88   :  { %v727_v21 = vpop.permute.xlu0 %102 }
  0x89   :  { %v106_v22 = vsel %vm105_vm1, %v96_v20, %v727_v21 }
  0x8a   :  { %555 = vmatmul.mubr.msk.f32.vlgmr.msra.gmra.mxu0 %vm135_vm2, %v106_v22  ;;  %v665_v22 = vmov 1966171168  }
  0x8b   :  { %607 = vmatprep.mubr.msk.f32.mxu0 %vm663_vm5, %v660_v3  ;;  %600 = vmatpush3.msra.mxu0 %v416_v6 }
  0x8c   :  { %601 = vmatprep.subr.mxu0 %v660_v3 }
  0x8d   :  { %602 = vmatpush3.msra.mxu0 %v415_v7 }
  0x8e   :  { %603 = vmatprep.subr.mxu0 %v660_v3 }
  0x8f   :  { %604 = vmatpush3.msra.mxu0 %v414_v8 }
  0x90   :  { %605 = vmatprep.subr.mxu0 %v660_v3 }
  0x91   :  { %606 = vmatpush3.msra.mxu0 %v413_v9 }
 0x14a   :  { %v205_v27 = vpop.f32.mrf.mxu0 }
 0x14b   :  { %v206_v38 = vadd.f32 %v205_v27, %v128_v37 }
 0x14c   :  { %v207_v28 = vpop.f32.mrf.mxu0 }
 0x14d   :  { %v208_v29 = vadd.f32 %v207_v28, %v132_v26 }
 0x14f   :  { %v211_v30 = vsel %vm210_vm3, %v208_v29, -inf }
 0x150   :  { %212 = vmax.xlane.f32.xlu0 %v211_v30 }
 0x1d9   :  { %v213_v31 = vpop.xlane.xlu0 %212 }
 0x1da   :  { %v214_v32 = vsub.f32 %v208_v29, %v213_v31 }
 0x1dc   :  { %v215_v33 = vmul.f32 1.442695, %v214_v32 }
 0x1de   :  { %619 = vpow2.f32 %v215_v33 }
 0x1eb   :  { %v620_v34 = vpop.eup %619 }
 0x1ec   :  { %v217_v35 = vsel %vm210_vm3, %v620_v34, 0.0 }
 0x1ed   :  { %218 = vadd.xlane.f32.xlu1 %v217_v35 }
 0x1fe   :  { %385 = vrot.lane.b32.xlu1 %v206_v38, %s662_s16 }
 0x202   :  { %395 = vrot.lane.b32.xlu1 %v206_v38, %s661_s0 }
 0x276   :  { %v219_v43 = vpop.xlane.xlu1 %218 }
 0x277   :  { %621 = vrcp.f32 %v219_v43 }
 0x27a   :  { %v386_v57 = vpop.permute.xlu1 %385 }
 0x27e   :  { %v396_v0 = vpop.permute.xlu1 %395 }
 0x284   :  { %v622_v44 = vpop.eup %621 }
 0x285   :  { %v221_v45 = vmul.f32 %v622_v44, %v620_v34 }
 0x287   :  { %586 = vmatmul.mubr.msk.f32.vlgmr.msra.gmra.mxu1 %vm226_vm6, %v221_v45  ;;  %531 = vst.msk [vmem:[%s827_s7 + $0x2] sm:$0x1] %vm529_vm7, %v221_v45 }
 0x288   :  { %589 = vmatpush3.msra.mxu1 %v309_v46  ;;  %596 = vmatprep.mubr.msk.f32.mxu1 %vm663_vm5, %v660_v3 }
 0x289   :  { %590 = vmatprep.subr.mxu1 %v660_v3 }
 0x28a   :  { %591 = vmatpush3.msra.mxu1 %v308_v47 }
 0x28b   :  { %592 = vmatprep.subr.mxu1 %v660_v3 }
 0x28c   :  { %593 = vmatpush3.msra.mxu1 %v307_v48 }
 0x28d   :  { %594 = vmatprep.subr.mxu1 %v660_v3 }
 0x28e   :  { %595 = vmatpush3.msra.mxu1 %v306_v49 }
 0x347   :  { %v300_v50 = vpop.f32.mrf.mxu1 }
 0x348   :  { %v304_v51 = vadd.f32 %v300_v50, %v206_v38 }
 0x349   :  { %v587_v52 = vpop.f32.mrf.mxu1 }
 0x34a   :  { %v305_v53 = vmax.f32 %v304_v51, 0.0 }
 0x34c   :  { %597 = vmatmul.mubr.msk.f32.vlgmr.msra.gmra.mxu1 %vm105_vm1, %v305_v53 }
 0x40c   :  { %v380_v55 = vpop.f32.mrf.mxu1 }
 0x40d   :  { %v381_v56 = vadd.f32 %v380_v55, %v310_v54 }
 0x40e   :  { %v598_v58 = vpop.f32.mrf.mxu1 }
 0x40f   :  { %v388_v59 = vadd.f32 %v386_v57, %v381_v56 }
 0x411   :  { %v559_v60 = vmul.f32 -1.442695, %v388_v59 }
 0x413   :  { %623 = vpow2.f32 %v559_v60 }
 0x420   :  { %v624_v61 = vpop.eup %623 }
 0x421   :  { %v392_v62 = vadd.f32 1.0, %v624_v61 }
 0x423   :  { %625 = vrcp.f32 %v392_v62 }
 0x430   :  { %v626_v63 = vpop.eup %625 }
 0x431   :  { %v398_v2 = vmul.f32 %v626_v63, %v396_v0  ;;  %v405_v11 = vsub.f32 1.0, %v626_v63  ;;  %v411_v13 = vmul.f32 %v626_v63, %v727_v21  ;;  %v510_v21 = vunpack.c.l.s4 %v665_v22 }
 0x433   :  { %400 = vrot.lane.b32.xlu1 %v398_v2, %s664_s13  ;;  %v511_v24 = vunpack.c.0.s8 %v510_v21 }
 0x435   :  { %v514_v25 = vsub.s32 %v511_v24, %v732_v23 }
 0x4a5   :  { %v401_v4 = vpop.permute.xlu1 %400 }
 0x4a6   :  { %v403_v5 = vadd.f32 %v401_v4, %v381_v56 }
 0x4a8   :  { %627 = vtanh.f32 %v403_v5 }
 0x4b5   :  { %v628_v10 = vpop.eup %627 }
 0x4b6   :  { %407 = vrot.lane.b32.xlu1 %v628_v10, %s662_s16 }
 0x528   :  { %v408_v12 = vpop.permute.xlu1 %407 }
 0x529   :  { %v410_v14 = vmul.f32 %v408_v12, %v405_v11 }
 0x52b   :  { %v412_v15 = vadd.f32 %v411_v13, %v410_v14 }
 0x52d   :  { %419 = vrot.lane.b32.xlu1 %v412_v15, %s662_s16  ;;  %v515_v26 = vrot.slane %v412_v15, %v514_v25 }
 0x52f   :  { %v522_v27 = vrot.slane %v515_v26, %v514_v25 }
 0x59f   :  { %v420_v16 = vpop.permute.xlu1 %419 }
 0x5a0   :  { %608 = vmatmul.mubr.msk.f32.vlgmr.msra.gmra.mxu0 %vm105_vm1, %v420_v16 }
 0x660   :  { %v489_v3 = vpop.f32.mrf.mxu0 }
 0x661   :  { %v490_v18 = vadd.f32 %v489_v3, %v417_v17 }
 0x662   :  { %v609_v19 = vpop.f32.mrf.mxu0 }
 0x663   :  { %v494_v20 = vsel %vm493_vm8, %v490_v18, -inf }
 0x664   :  { %495 = vmax.xlane.f32.xlu0 %v494_v20 }
 0x67a   :  { %523 = vrot.lane.b32.xlu0 %v522_v27, %s662_s16 }
 0x6ed   :  { %v496_v28 = vpop.xlane.xlu0 %495 }
 0x6ee   :  { %v497_v29 = vsub.f32 %v490_v18, %v496_v28 }
 0x6f0   :  { %v498_v30 = vmul.f32 1.442695, %v497_v29 }
 0x6f1   :  { %v524_v31 = vpop.permute.xlu0 %523 }
 0x6f2   :  { %629 = vpow2.f32 %v498_v30  ;;  %528 = vst.msk [vmem:[%s827_s7 + $0x1] sm:$0x1] %vm526_vm9, %v524_v31 }
 0x6ff   :  { %v630_v32 = vpop.eup %629 }
 0x700   :  { %v500_v33 = vsel %vm493_vm8, %v630_v32, 0.0 }
 0x701   :  { %501 = vadd.xlane.f32.xlu1 %v500_v33 }
 0x78a   :  { %v502_v23 = vpop.xlane.xlu1 %501 }
 0x78b   :  { %631 = vlog2.f32 %v502_v23 }
 0x798   :  { %v632_v34 = vpop.eup %631 }
 0x799   :  { %v504_v35 = vmul.f32 0.6931472, %v632_v34 }
 0x79b   :  { %v505_v36 = vsub.f32 %v497_v29, %v504_v35 }
 0x79d   :  { %508 = vst.msk [vmem:[%s827_s7] sm:$0x1] %vm506_vm10, %v505_v36 }
 0x79e   :  { %536 = vsyncpa [#allocation6], 1 }
 0x79f   :  { %537 = vsyncmov [#allocation3] }
 0x7a2   :  { %s538_s22 = vpop.sfrf %537 }
 0x7a3   :  { %p561_p5 = scmp.ne.s32.totalorder %s538_s22, 0 }
 0x7a5   :  { %542 = shalt.err (%p561_p5)  }

</bundles_post_ra>
